<compile_context>
chip_gen: v7x
topology: tpu7x:2x2x1
jax: 0.10.0
libtpu: 0.0.40
codegen_flags: <defaults>
</compile_context>

<pallas_src>
import functools

import jax
import jax.numpy as jnp
from jax import lax
from jax.experimental import pallas as pl
from jax.experimental.pallas import tpu as pltpu

_LANE = 128
_TB = 8  # batch tile = one full sublane group


def _round_up(x, m):
    return ((x + m - 1) // m) * m


def _aug_avg_kernel(curr, apply_log_softmax,
                    x_ref, w1_ref, w1sum_ref, b1_ref, w2_ref, b2_ref,
                    scale_ref, shift_ref,                       # (curr*TB, 1) f32 columns
                    out_ref,                                    # (TB, Kp) f32
                    acc_ref):                                   # (TB, Hd) f32 scratch
    k = pl.program_id(1)
    nk = pl.num_programs(1)

    # --- D-reduction: accumulate x @ W1 across the k grid axis -------------
    @pl.when(k == 0)
    def _():
        acc_ref[...] = jnp.zeros_like(acc_ref)

    acc_ref[...] += jnp.dot(x_ref[...], w1_ref[...],
                            preferred_element_type=jnp.float32)

    # --- epilogue on the last k step ----------------------------------------
    @pl.when(k == nk - 1)
    def _():
        TB = x_ref.shape[0]
        Kp = w2_ref.shape[1]

        xw1 = acc_ref[...]                              # (TB, Hd) f32
        # Affine-aug hoist: (s*x + t) @ W1 + b1 == s*(x@W1) + t*colsum(W1) + b1.
        # All copies in one broadcasted VPU pass over a stacked in-register value.
        xw1_stk = jnp.tile(xw1, (curr, 1))              # (curr*TB, Hd)
        h = jnp.maximum(scale_ref[...] * xw1_stk
                        + shift_ref[...] * w1sum_ref[...]
                        + b1_ref[...], 0.0)             # (curr*TB, Hd) f32

        # Padded class lanes of b2 were pre-set to -1e30 -> no in-kernel masking.
        logits = jnp.dot(h.astype(w2_ref.dtype), w2_ref[...],
                         preferred_element_type=jnp.float32) + b2_ref[...]  # (curr*TB, Kp)

        if apply_log_softmax:
            m = jnp.max(logits, axis=-1, keepdims=True)
            s = logits - m
            lse = jnp.log(jnp.sum(jnp.exp(s), axis=-1, keepdims=True))
            vals = (s - lse).reshape(curr, TB, Kp)      # tile-aligned split (TB == 8)
            out_ref[...] = (jnp.sum(vals, axis=0) * (1.0 / float(curr))
                            ).astype(out_ref.dtype)
        else:
            out_ref[...] = logits.astype(out_ref.dtype)


def prepare_aug_averaged_params(params, *, tk=None):
    """One-time parameter preprocessing (hoisted out of the per-forward path)."""
    w1 = params["w1"].astype(jnp.float32)
    b1 = params["b1"].astype(jnp.float32).reshape(1, -1)
    w2 = params["w2"].astype(jnp.float32)
    b2 = params["b2"].astype(jnp.float32).reshape(1, -1)

    D, Hd = w1.shape
    K = w2.shape[1]
    Kp = _round_up(K, _LANE)

    # Reduction tile over D: multiple of 128, capped at 2048 (0.5 MiB bf16 w1
    # tile at Hd=128), never larger than the lane-rounded D.
    if tk is None:
        tk = 2048
    tk = max(_LANE, (int(tk) // _LANE) * _LANE)
    tk = min(tk, _round_up(D, _LANE))
    Dp = _round_up(D, tk)

    # colsum(W1) in f32 for the affine-aug hoist.
    w1_colsum = jnp.sum(w1, axis=0, keepdims=True)                  # (1, Hd)

    # Zero-pad D (pad rows contribute nothing), cast MXU operand to bf16 once.
    w1_bf = jnp.zeros((Dp, Hd), jnp.float32).at[:D].set(w1).astype(jnp.bfloat16)

    # Lane-dense class dim; padded bias columns carry -1e30 so padded logits
    # are pre-masked for the (f32) softmax.  Padded lanes are sliced off later.
    w2p_bf = jnp.zeros((Hd, Kp), jnp.float32).at[:, :K].set(w2).astype(jnp.bfloat16)
    b2p = jnp.full((1, Kp), -1e30, jnp.float32).at[:, :K].set(b2)

    return dict(
        w1_bf=w1_bf, w1_colsum=w1_colsum, b1=b1, w2p_bf=w2p_bf, b2p=b2p,
        aug_scale=params["aug_scale"].astype(jnp.float32),
        aug_shift=params["aug_shift"].astype(jnp.float32),
        D=int(D), Dp=int(Dp), Hd=int(Hd), K=int(K), Kp=int(Kp), tk=int(tk),
    )


def _vmem_budget_bytes(tb, tk, hd, kp, curr):
    """Scoped-VMEM budget: double-buffered tiles + resident smalls + headroom."""
    bf16, f32 = 2, 4
    tile = lambda r, c, b: max(r, 8) * max(c, _LANE) * b   # (8,128) padded tiles
    need = 0
    need += 2 * tile(tb, tk, bf16)                  # x tile (double-buffered)
    need += 2 * tile(tk, hd, bf16)                  # w1 tile (double-buffered)
    need += 2 * tile(hd, kp, bf16)                  # w2 (resident)
    need += 2 * (2 * tile(1, hd, f32) + tile(1, kp, f32))   # w1sum, b1, b2p
    need += 2 * 2 * tile(curr * tb, 1, f32)         # scale / shift columns
    need += tile(tb, hd, f32)                       # acc scratch
    need += 2 * tile(tb, kp, f32)                   # output tile
    return int(need + (8 << 20))                    # headroom for compiler scratch


def aug_averaged_forward(x_nchw, prepared, *, ncopies=4, ncopies_tr=1, training=False):
    """Pallas implementation of AugAveragedModel.forward."""
    curr = ncopies_tr if training else ncopies
    apply_log_softmax = curr > 1

    B = x_nchw.shape[0]
    D, Dp, tk = prepared["D"], prepared["Dp"], prepared["tk"]
    Hd, K, Kp = prepared["Hd"], prepared["K"], prepared["Kp"]

    TB = _TB
    Bp = _round_up(B, TB)
    nb = Bp // TB
    nk = Dp // tk

    # Batch pad to a full sublane group + D pad, then bf16 MXU operand.
    x_flat = x_nchw.reshape(B, -1).astype(jnp.float32)
    x_p = jnp.zeros((Bp, Dp), jnp.float32).at[:B, :D].set(x_flat).astype(jnp.bfloat16)

    # Per-copy affine aug parameters as (curr*TB, 1) column vectors: row i
    # belongs to copy i // TB, matching the jnp.tile stacking in the kernel.
    scale_col = jnp.repeat(prepared["aug_scale"][:curr], TB).reshape(curr * TB, 1)
    shift_col = jnp.repeat(prepared["aug_shift"][:curr], TB).reshape(curr * TB, 1)

    kernel = functools.partial(_aug_avg_kernel, curr, apply_log_softmax)

    grid_spec = pltpu.PrefetchScalarGridSpec(
        num_scalar_prefetch=0,
        grid=(nb, nk),                               # (parallel batch, arbitrary D-reduction)
        in_specs=[
            pl.BlockSpec((TB, tk), lambda b, k: (b, k)),      # x tile
            pl.BlockSpec((tk, Hd), lambda b, k: (k, 0)),      # w1 tile (bf16)
            pl.BlockSpec((1, Hd), lambda b, k: (0, 0)),       # colsum(w1)   (resident)
            pl.BlockSpec((1, Hd), lambda b, k: (0, 0)),       # b1           (resident)
            pl.BlockSpec((Hd, Kp), lambda b, k: (0, 0)),      # w2 padded    (resident)
            pl.BlockSpec((1, Kp), lambda b, k: (0, 0)),       # b2 padded    (resident)
            pl.BlockSpec((curr * TB, 1), lambda b, k: (0, 0)),  # scale column
            pl.BlockSpec((curr * TB, 1), lambda b, k: (0, 0)),  # shift column
        ],
        out_specs=pl.BlockSpec((TB, Kp), lambda b, k: (b, 0)),
        scratch_shapes=[pltpu.VMEM((TB, Hd), jnp.float32)],    # x@W1 accumulator
    )

    out_padded = pl.pallas_call(
        kernel,
        out_shape=jax.ShapeDtypeStruct((Bp, Kp), jnp.float32),
        grid_spec=grid_spec,
        compiler_params=pltpu.CompilerParams(
            dimension_semantics=("parallel", "arbitrary"),
            vmem_limit_bytes=_vmem_budget_bytes(TB, tk, Hd, Kp, curr),
        ),
    )(x_p, prepared["w1_bf"], prepared["w1_colsum"], prepared["b1"],
      prepared["w2p_bf"], prepared["b2p"], scale_col, shift_col)

    return out_padded[:B, :K]


def _reference_forward(x_nchw, params, *, ncopies=4, ncopies_tr=1, training=False):
    """Pure-JAX f32 reference mirroring the PyTorch module."""
    curr = ncopies_tr if training else ncopies
    B = x_nchw.shape[0]
    x_flat = x_nchw.reshape(B, -1).astype(jnp.float32)
    outs = []
    for c in range(curr):
        xa = x_flat * params["aug_scale"][c] + params["aug_shift"][c]
        h = jnp.maximum(xa @ params["w1"] + params["b1"], 0.0)
        logits = h @ params["w2"] + params["b2"]
        if curr > 1:
            outs.append(jax.nn.log_softmax(logits, axis=-1))
        else:
            outs.append(logits)
    return sum(outs) / curr


if __name__ == "__main__":
    # Small deterministic shapes: x is NCHW [2, 4, 16, 16]  ->  D = 1024
    B, C, H, W = 2, 4, 16, 16
    D = C * H * W
    HIDDEN = 128
    NUM_CLASSES = 10
    NCOPIES = 4

    key = jax.random.PRNGKey(0)
    kx, kw1, kw2, kb2, ka = jax.random.split(key, 5)

    x = jax.random.normal(kx, (B, C, H, W), dtype=jnp.float32)

    params = {
        "w1": jax.random.normal(kw1, (D, HIDDEN), dtype=jnp.float32) * 0.02,
        "b1": jnp.zeros((1, HIDDEN), dtype=jnp.float32),
        "w2": jax.random.normal(kw2, (HIDDEN, NUM_CLASSES), dtype=jnp.float32) * 0.1,
        "b2": jax.random.normal(kb2, (1, NUM_CLASSES), dtype=jnp.float32) * 0.01,
        # per-copy deterministic "sampled" augmentation parameters
        "aug_scale": 1.0 + 0.1 * jnp.arange(NCOPIES, dtype=jnp.float32),
        "aug_shift": 0.05 * jax.random.normal(ka, (NCOPIES,), dtype=jnp.float32),
    }

    # One-time weight preprocessing (bf16 cast, colsum, class-lane padding).
    # tk=512 -> 2 reduction steps at D=1024 so the accumulator path is exercised;
    # production (image-scale D) would use the default tk=2048.
    prepared = prepare_aug_averaged_params(params, tk=512)

    # Inference path (ncopies=4 > 1): augment-forward-average with log_softmax.
    out = aug_averaged_forward(x, prepared, ncopies=NCOPIES, ncopies_tr=1, training=False)
    out = jax.block_until_ready(out)
    ref = _reference_forward(x, params, ncopies=NCOPIES, ncopies_tr=1, training=False)
    assert out.shape == (B, NUM_CLASSES)
    # bf16 MXU operands (f32 accumulation) vs. the pure-f32 reference.
    assert jnp.allclose(out, ref, atol=2e-2, rtol=2e-2), (
        f"max abs diff {jnp.max(jnp.abs(out - ref))}")

    # Training path (ncopies_tr=1): plain logits, no log_softmax / averaging.
    out_tr = aug_averaged_forward(x, prepared, ncopies=NCOPIES, ncopies_tr=1, training=True)
    out_tr = jax.block_until_ready(out_tr)
    ref_tr = _reference_forward(x, params, ncopies=NCOPIES, ncopies_tr=1, training=True)
    assert out_tr.shape == (B, NUM_CLASSES)
    assert jnp.allclose(out_tr, ref_tr, atol=2e-2, rtol=2e-2), (
        f"max abs diff {jnp.max(jnp.abs(out_tr - ref_tr))}")

    print("KERNEL_OK")
</pallas_src>

<mosaic_0001>
module attributes {stable_mosaic.version = 11 : i64} {
  func.func @_aug_avg_kernel(%arg0: i32, %arg1: i32, %arg2: memref<8x512xbf16, #tpu.memory_space<vmem>>, %arg3: memref<512x128xbf16, #tpu.memory_space<vmem>>, %arg4: memref<1x128xf32, #tpu.memory_space<vmem>>, %arg5: memref<1x128xf32, #tpu.memory_space<vmem>>, %arg6: memref<128x128xbf16, #tpu.memory_space<vmem>>, %arg7: memref<1x128xf32, #tpu.memory_space<vmem>>, %arg8: memref<32x1xf32, #tpu.memory_space<vmem>>, %arg9: memref<32x1xf32, #tpu.memory_space<vmem>>, %arg10: memref<8x128xf32, #tpu.memory_space<vmem>>, %arg11: memref<8x128xf32, #tpu.memory_space<vmem>>) attributes {dimension_semantics = [#tpu.dimension_semantics<parallel>, #tpu.dimension_semantics<arbitrary>], iteration_bounds = array<i64: 1, 2>, scalar_prefetch = 0 : i64, scratch_operands = 1 : i64, tpu.core_type = #tpu.core_type<tc>, window_params = [{transform_indices = @transform_0, window_bounds = array<i64: 8, 512>}, {transform_indices = @transform_1, window_bounds = array<i64: 512, 128>}, {pipeline_mode = #tpu.pipeline_mode<synchronous>, transform_indices = @transform_2, window_bounds = array<i64: 1, 128>}, {pipeline_mode = #tpu.pipeline_mode<synchronous>, transform_indices = @transform_3, window_bounds = array<i64: 1, 128>}, {pipeline_mode = #tpu.pipeline_mode<synchronous>, transform_indices = @transform_4, window_bounds = array<i64: 128, 128>}, {pipeline_mode = #tpu.pipeline_mode<synchronous>, transform_indices = @transform_5, window_bounds = array<i64: 1, 128>}, {pipeline_mode = #tpu.pipeline_mode<synchronous>, transform_indices = @transform_6, window_bounds = array<i64: 32, 1>}, {pipeline_mode = #tpu.pipeline_mode<synchronous>, transform_indices = @transform_7, window_bounds = array<i64: 32, 1>}, {transform_indices = @transform_8, window_bounds = array<i64: 8, 128>}]} {
    %c0_i32 = arith.constant 0 : i32
    %0 = arith.cmpi eq, %arg1, %c0_i32 : i32
    %1 = arith.extui %0 : i1 to i32
    %c0_i32_0 = arith.constant 0 : i32
    %2 = arith.cmpi ne, %1, %c0_i32_0 : i32
    scf.if %2 {
      %cst_9 = arith.constant 0.000000e+00 : f32
      %12 = vector.broadcast %cst_9 : f32 to vector<8x128xf32>
      %c0_10 = arith.constant 0 : index
      %c0_11 = arith.constant 0 : index
      %13 = vector.load %arg11[%c0_10, %c0_11] : memref<8x128xf32, #tpu.memory_space<vmem>>, vector<8x128xf32>
      tpu.vector_store %arg11[%c0_10, %c0_11], %12 {strides = array<i32>} : memref<8x128xf32, #tpu.memory_space<vmem>>, vector<8x128xf32>,
    } else {
    }
    %c0 = arith.constant 0 : index
    %c0_1 = arith.constant 0 : index
    %3 = vector.load %arg11[%c0, %c0_1] : memref<8x128xf32, #tpu.memory_space<vmem>>, vector<8x128xf32>
    %c0_2 = arith.constant 0 : index
    %c0_3 = arith.constant 0 : index
    %4 = vector.load %arg2[%c0_2, %c0_3] : memref<8x512xbf16, #tpu.memory_space<vmem>>, vector<8x512xbf16>
    %c0_4 = arith.constant 0 : index
    %c0_5 = arith.constant 0 : index
    %5 = vector.load %arg3[%c0_4, %c0_5] : memref<512x128xbf16, #tpu.memory_space<vmem>>, vector<512x128xbf16>
    %cst = arith.constant dense<0.000000e+00> : vector<8x128xf32>
    %6 = tpu.matmul %4, %5, %cst {dimension_numbers = #tpu.dot_dimension_numbers<[1], [0], [0], [1], [0, 0, 1, 1], [], []>} : vector<8x512xbf16>, vector<512x128xbf16>, vector<8x128xf32> -> vector<8x128xf32>
    %7 = arith.addf %3, %6 : vector<8x128xf32>
    %c0_6 = arith.constant 0 : index
    %c0_7 = arith.constant 0 : index
    %8 = vector.load %arg11[%c0_6, %c0_7] : memref<8x128xf32, #tpu.memory_space<vmem>>, vector<8x128xf32>
    tpu.vector_store %arg11[%c0_6, %c0_7], %7 {strides = array<i32>} : memref<8x128xf32, #tpu.memory_space<vmem>>, vector<8x128xf32>,
    %c1_i32 = arith.constant 1 : i32
    %9 = arith.cmpi eq, %arg1, %c1_i32 : i32
    %10 = arith.extui %9 : i1 to i32
    %c0_i32_8 = arith.constant 0 : i32
    %11 = arith.cmpi ne, %10, %c0_i32_8 : i32
    scf.if %11 {
      %c0_9 = arith.constant 0 : index
      %c0_10 = arith.constant 0 : index
      %12 = vector.load %arg11[%c0_9, %c0_10] : memref<8x128xf32, #tpu.memory_space<vmem>>, vector<8x128xf32>
      %13 = tpu.concatenate %12, %12, %12, %12 in 0 : vector<8x128xf32>, vector<8x128xf32>, vector<8x128xf32>, vector<8x128xf32> -> vector<32x128xf32>
      %c0_11 = arith.constant 0 : index
      %c0_12 = arith.constant 0 : index
      %14 = vector.load %arg8[%c0_11, %c0_12] : memref<32x1xf32, #tpu.memory_space<vmem>>, vector<32x1xf32>
      %15 = vector.broadcast %14 : vector<32x1xf32> to vector<32x128xf32>
      %16 = arith.mulf %15, %13 : vector<32x128xf32>
      %c0_13 = arith.constant 0 : index
      %c0_14 = arith.constant 0 : index
      %17 = vector.load %arg9[%c0_13, %c0_14] : memref<32x1xf32, #tpu.memory_space<vmem>>, vector<32x1xf32>
      %c0_15 = arith.constant 0 : index
      %c0_16 = arith.constant 0 : index
      %18 = vector.load %arg4[%c0_15, %c0_16] : memref<1x128xf32, #tpu.memory_space<vmem>>, vector<1x128xf32>
      %19 = vector.broadcast %17 : vector<32x1xf32> to vector<32x128xf32>
      %20 = vector.broadcast %18 : vector<1x128xf32> to vector<32x128xf32>
      %21 = arith.mulf %19, %20 : vector<32x128xf32>
      %22 = arith.addf %16, %21 : vector<32x128xf32>
      %c0_17 = arith.constant 0 : index
      %c0_18 = arith.constant 0 : index
      %23 = vector.load %arg5[%c0_17, %c0_18] : memref<1x128xf32, #tpu.memory_space<vmem>>, vector<1x128xf32>
      %24 = vector.broadcast %23 : vector<1x128xf32> to vector<32x128xf32>
      %25 = arith.addf %22, %24 : vector<32x128xf32>
      %cst_19 = arith.constant 0.000000e+00 : f32
      %26 = vector.broadcast %cst_19 : f32 to vector<32x128xf32>
      %27 = arith.maximumf %25, %26 : vector<32x128xf32>
      %28 = arith.truncf %27 : vector<32x128xf32> to vector<32x128xbf16>
      %c0_20 = arith.constant 0 : index
      %c0_21 = arith.constant 0 : index
      %29 = vector.load %arg6[%c0_20, %c0_21] : memref<128x128xbf16, #tpu.memory_space<vmem>>, vector<128x128xbf16>
      %cst_22 = arith.constant dense<0.000000e+00> : vector<32x128xf32>
      %30 = tpu.matmul %28, %29, %cst_22 {dimension_numbers = #tpu.dot_dimension_numbers<[1], [0], [0], [1], [0, 0, 1, 1], [], []>} : vector<32x128xbf16>, vector<128x128xbf16>, vector<32x128xf32> -> vector<32x128xf32>
      %c0_23 = arith.constant 0 : index
      %c0_24 = arith.constant 0 : index
      %31 = vector.load %arg7[%c0_23, %c0_24] : memref<1x128xf32, #tpu.memory_space<vmem>>, vector<1x128xf32>
      %32 = vector.broadcast %31 : vector<1x128xf32> to vector<32x128xf32>
      %33 = arith.addf %30, %32 : vector<32x128xf32>
      %cst_25 = arith.constant dense<0xFF800000> : vector<32xf32>
      %34 = vector.multi_reduction <maximumf>, %33, %cst_25 [1] : vector<32x128xf32> to vector<32xf32>
      %35 = vector.shape_cast %34 : vector<32xf32> to vector<32x1xf32>
      %36 = vector.broadcast %35 : vector<32x1xf32> to vector<32x128xf32>
      %37 = arith.subf %33, %36 : vector<32x128xf32>
      %38 = math.exp %37 : vector<32x128xf32>
      %cst_26 = arith.constant dense<0.000000e+00> : vector<32xf32>
      %39 = vector.multi_reduction <add>, %38, %cst_26 [1] : vector<32x128xf32> to vector<32xf32>
      %40 = vector.shape_cast %39 : vector<32xf32> to vector<32x1xf32>
      %41 = math.log %40 : vector<32x1xf32>
      %42 = vector.broadcast %41 : vector<32x1xf32> to vector<32x128xf32>
      %43 = arith.subf %37, %42 : vector<32x128xf32>
      %44 = vector.shape_cast %43 : vector<32x128xf32> to vector<4x8x128xf32>
      %cst_27 = arith.constant dense<0.000000e+00> : vector<8x128xf32>
      %45 = vector.multi_reduction <add>, %44, %cst_27 [0] : vector<4x8x128xf32> to vector<8x128xf32>
      %cst_28 = arith.constant 2.500000e-01 : f32
      %46 = vector.broadcast %cst_28 : f32 to vector<8x128xf32>
      %47 = arith.mulf %45, %46 : vector<8x128xf32>
      %c0_29 = arith.constant 0 : index
      %c0_30 = arith.constant 0 : index
      %48 = vector.load %arg10[%c0_29, %c0_30] : memref<8x128xf32, #tpu.memory_space<vmem>>, vector<8x128xf32>
      tpu.vector_store %arg10[%c0_29, %c0_30], %47 {strides = array<i32>} : memref<8x128xf32, #tpu.memory_space<vmem>>, vector<8x128xf32>,
    } else {
    }
    return
  }
  func.func @transform_0(%arg0: i32, %arg1: i32) -> (i32, i32) {
    %c0_i32 = arith.constant 0 : i32
    return %arg0, %arg1 : i32, i32
  }
  func.func @transform_1(%arg0: i32, %arg1: i32) -> (i32, i32) {
    %c0_i32 = arith.constant 0 : i32
    %c0_i32_0 = arith.constant 0 : i32
    return %arg1, %c0_i32 : i32, i32
  }
  func.func @transform_2(%arg0: i32, %arg1: i32) -> (i32, i32) {
    %c0_i32 = arith.constant 0 : i32
    %c0_i32_0 = arith.constant 0 : i32
    %c0_i32_1 = arith.constant 0 : i32
    return %c0_i32, %c0_i32_0 : i32, i32
  }
  func.func @transform_3(%arg0: i32, %arg1: i32) -> (i32, i32) {
    %c0_i32 = arith.constant 0 : i32
    %c0_i32_0 = arith.constant 0 : i32
    %c0_i32_1 = arith.constant 0 : i32
    return %c0_i32, %c0_i32_0 : i32, i32
  }
  func.func @transform_4(%arg0: i32, %arg1: i32) -> (i32, i32) {
    %c0_i32 = arith.constant 0 : i32
    %c0_i32_0 = arith.constant 0 : i32
    %c0_i32_1 = arith.constant 0 : i32
    return %c0_i32, %c0_i32_0 : i32, i32
  }
  func.func @transform_5(%arg0: i32, %arg1: i32) -> (i32, i32) {
    %c0_i32 = arith.constant 0 : i32
    %c0_i32_0 = arith.constant 0 : i32
    %c0_i32_1 = arith.constant 0 : i32
    return %c0_i32, %c0_i32_0 : i32, i32
  }
  func.func @transform_6(%arg0: i32, %arg1: i32) -> (i32, i32) {
    %c0_i32 = arith.constant 0 : i32
    %c0_i32_0 = arith.constant 0 : i32
    %c0_i32_1 = arith.constant 0 : i32
    return %c0_i32, %c0_i32_0 : i32, i32
  }
  func.func @transform_7(%arg0: i32, %arg1: i32) -> (i32, i32) {
    %c0_i32 = arith.constant 0 : i32
    %c0_i32_0 = arith.constant 0 : i32
    %c0_i32_1 = arith.constant 0 : i32
    return %c0_i32, %c0_i32_0 : i32, i32
  }
  func.func @transform_8(%arg0: i32, %arg1: i32) -> (i32, i32) {
    %c0_i32 = arith.constant 0 : i32
    %c0_i32_0 = arith.constant 0 : i32
    return %arg0, %c0_i32 : i32, i32
  }
}

</mosaic_0001>

<bundles_post_ra>
// kernel: tpu_custom_call.1
= control target key start
LH: loop header
LB: loop body
LE: loop exit
PB: predicated region body
PF: predicated region fallthrough
CT: control target
= control target key end

     0   :  { %13 = vsyncpa [#allocation4], 0  ;;  %s1852_s0 = inlined_call_operand.hbm [shape: bf16[8,1024], index: 0, kind: input, shape index: {}]   ;;  %s1853_s1 = inlined_call_operand.hbm [shape: bf16[1024,128], index: 1, kind: input, shape index: {}]   ;;  %s1854_s2 = inlined_call_operand.vmem [shape: f32[1,128], index: 2, kind: input, shape index: {}]   ;;  %s1855_s3 = inlined_call_operand.vmem [shape: f32[1,128], index: 3, kind: input, shape index: {}]   ;;  %s1856_s4 = inlined_call_operand.vmem [shape: bf16[128,128], index: 4, kind: input, shape index: {}]   ;;  %s1857_s5 = inlined_call_operand.vmem [shape: f32[1,128], index: 5, kind: input, shape index: {}]   ;;  %s1858_s6 = inlined_call_operand.vmem [shape: f32[32,1], index: 6, kind: input, shape index: {}]   ;;  %s1859_s7 = inlined_call_operand.vmem [shape: f32[32,1], index: 7, kind: input, shape index: {}]   ;;  %s1860_s8 = inlined_call_operand.hbm [shape: f32[8,128], index: 8, kind: output, shape index: {}]  }
   0x1   :  { %15 = vsyncpa [#allocation4 + $0x1], 0 }
   0x2   :  { %16 = vsyncpa [#allocation7], 0 }
   0x3   :  { %18 = vsyncpa [#allocation7 + $0x1], 0 }
   0x4   :  { %19 = vsyncpa [#allocation5], 0  ;;  %s1556_s27 = smov 0   ;;  %s1558_s28 = smov 0  }
   0x5   :  { %s1560_s29 = smov 0   ;;  %s1562_s30 = smov 0  }
   0x6   :  { %s1564_s9 = smov 0   ;;  %s1566_s10 = smov 0  }
   0x7 LB: > { %s1861_s11 = sadd.s32 4294967295, %s1502_s10   ;;  %s34_s12 = sadd.s32 1, %s1498_s9  ;;  %s1502_s10 = sphi %s1566_s10, %s25_s10   ;;  %s1498_s9 = sphi %s1564_s9, %s1876_s9   ;;  %s1494_s30 = sphi %s1562_s30, %s1875_s30   ;;  %s1490_s29 = sphi %s1560_s29, %s1874_s29   ;;  %s1486_s28 = sphi %s1558_s28, %s1873_s28   ;;  %s1482_s27 = sphi %s1556_s27, %s1872_s27  }
   0x8   : > { %p35_p0 = scmp.ge.s32.totalorder %s34_s12, 2  ;;  %s46_s13 = sadd.s32 1, %s1490_s29 }
   0x9   : > { %p53_p1 = scmp.ne.s32.totalorder %s1490_s29, %s1486_s28  ;;  %p54_p2 = scmp.eq.s32.totalorder %s1502_s10, 0 }
   0xa   : > { %s1878_s12 = smov (%p35_p0, %s34_s12), 0  ;;  %p59_p4 = scmp.ne.s32.totalorder %s1486_s28, %s1482_s27 }
   0xb   : > { %p1592_p3 = por %p54_p2, %p53_p1  ;;  %s42_s15 = ssub.s32 %s1498_s9, %s1878_s12 }
   0xc   : > { %p60_p5 = scmp.eq.s32.totalorder %s1861_s11, 0  ;;  %p44_p6 = scmp.eq.s32.totalorder %s42_s15, 0 }
   0xd   : > { %p1240_p8 = scmp.lt.s32.totalorder %s1502_s10, 2  ;;  %s1610_s18 = sand.u32 1, %s1490_s29  }
   0xe   : > { %p1601_p7 = por %p60_p5, %p59_p4  ;;  %s1149_s19 = sshll.u32 %s1498_s9, 8 }
   0xf   : > { %s1607_s17 = scalar_select %p44_p6, %s1490_s29, %s46_s13  }
  0x10   : > { %s1864_s16 = scalar_select %p1601_p7, 1, 0 }
  0x11   : > { %s1087_s20 = sshll.u32 %s1610_s18, 4  ;;  %s1617_s23 = scalar_lea.hbm %s1852_s0, %s1149_s19 }
  0x12   : > { %s283_s24 = scalar_lea.vmem [#allocation3], %s1087_s20  ;;  %p1621_p9 = pnand %p1240_p8, %p1592_p3 }
  0x13   : > { %s293_s25 = sshll.u32 %s283_s24, 4  ;;  %s280_s27 = scalar_lea.sflag [#allocation4], %s1610_s18  ;;  %s1625_s25 = int_to_ptr.vmem [resolvable:$true] %s293_s25 }
  0x14   : > { %s1358_s13 = scalar_lea.hbm %s1617_s23, 256  ;;  %p1360_p13 = pneg %p1621_p9 }
  0x15   : > { %p1359_p12 = scmp.ne.s32.totalorder %s1617_s23, %s1358_s13  ;;  %s1363_s19 = scalar_lea.hbm %s1852_s0, 512 }
  0x16   : > { %p1364_p2 = scmp.lt.u32.totalorder %s1617_s23, %s1852_s0  ;;  %p1365_p3 = scmp.lt.u32.totalorder %s1363_s19, %s1358_s13 }
  0x17   : > { %p1361_p0 = pnand %p1360_p13, %p1359_p12  ;;  %p1367_p5 = scmp.lt.u32.totalorder %s1358_s13, %s1617_s23 }
  0x18   : > { %p1366_p4 = por %p1365_p3, %p1364_p2 }
  0x19   : > { %p1362_p1 = pneg %p1361_p0 }
  0x1a   : > { %p1368_p6 = por %p1367_p5, %p1366_p4 }
  0x1c   : > { %p1369_p8 = pnand %p1368_p6, %p1362_p1 }
  0x1e   : > { %1372 = shalt.err (!%p1369_p8)
}
  0x1f   : > { %s1373_s22 = scalar_lea.vmem %s1625_s25, 256  ;;  %s1504_s24 = smov [#allocation3]  }
  0x20   : > { %p1374_p12 = scmp.ne.s32.totalorder %s1625_s25, %s1373_s22  ;;  %s1378_s14 = sshll.u32 %s1504_s24, 4  ;;  %s1379_s14 = int_to_ptr.vmem [resolvable:$false] %s1378_s14 }
  0x21   : > { %s1380_s15 = scalar_lea.vmem %s1379_s14, 512  ;;  %p1381_p11 = scmp.lt.s32.totalorder %s1625_s25, %s1379_s14 }
  0x22   : > { %p1376_p0 = pnand %p1374_p12, %p1360_p13  ;;  %p1382_p2 = scmp.lt.s32.totalorder %s1380_s15, %s1373_s22 }
  0x24   : > { %p1377_p10 = pneg %p1376_p0  ;;  %p1383_p3 = por %p1382_p2, %p1381_p11 }
  0x26   : > { %p1384_p4 = pnand %p1383_p3, %p1377_p10 }
  0x28   : > { %1387 = shalt.err (!%p1384_p4)
}
  0x29   : > { %1236 = dma.hbm_to_vmem [thread:$0]  (!%p1621_p9), %s1617_s23, 256, %s1625_s25, %s280_s27  }
  0x2a   : > { %p1866_p1 = scmp.lt.s32.totalorder %s1502_s10, 3  ;;  %p1867_p5 = scmp.ge.s32.totalorder %s1502_s10, 1 }
  0x2b   : > { %s1090_s19 = sshll.u32 %s1610_s18, 8  ;;  %s1150_s20 = sshll.u32 %s1498_s9, 12 }
  0x2c   : > { %p1659_p6 = pnand %p1867_p5, %p1866_p1  ;;  %s1668_s24 = scalar_lea.hbm %s1853_s1, %s1150_s20 }
  0x2d   : > { %s304_s14 = scalar_lea.vmem [#allocation6], %s1090_s19  ;;  %s301_s23 = scalar_lea.sflag [#allocation7], %s1610_s18 }
  0x2e   : > { %s311_s15 = sshll.u32 %s304_s14, 4  ;;  %s1388_s25 = scalar_lea.hbm %s1668_s24, 4096  ;;  %s1670_s15 = int_to_ptr.vmem [resolvable:$true] %s311_s15 }
  0x2f   : > { %p1389_p10 = scmp.ne.s32.totalorder %s1668_s24, %s1388_s25  ;;  %s1393_s20 = scalar_lea.hbm %s1853_s1, 8192 }
  0x30   : > { %p1394_p12 = scmp.lt.u32.totalorder %s1668_s24, %s1853_s1  ;;  %p1395_p0 = scmp.lt.u32.totalorder %s1393_s20, %s1388_s25 }
  0x31   : > { %p1391_p11 = pnand %p1389_p10, %p1360_p13  ;;  %p1397_p3 = scmp.lt.u32.totalorder %s1388_s25, %s1668_s24 }
  0x32   : > { %p1396_p2 = por %p1395_p0, %p1394_p12 }
  0x33   : > { %p1392_p8 = pneg %p1391_p11 }
  0x34   : > { %p1398_p4 = por %p1397_p3, %p1396_p2 }
  0x36   : > { %p1399_p1 = pnand %p1398_p4, %p1392_p8 }
  0x38   : > { %1402 = shalt.err (!%p1399_p1)
}
  0x39   : > { %s1403_s19 = scalar_lea.vmem %s1670_s15, 4096  ;;  %s1505_s11 = smov [#allocation6]  }
  0x3a   : > { %p1404_p5 = scmp.ne.s32.totalorder %s1670_s15, %s1403_s19  ;;  %s1408_s14 = sshll.u32 %s1505_s11, 4  ;;  %s1409_s14 = int_to_ptr.vmem [resolvable:$false] %s1408_s14 }
  0x3b   : > { %s1410_s27 = scalar_lea.vmem %s1409_s14, 8192  ;;  %p1411_p7 = scmp.lt.s32.totalorder %s1670_s15, %s1409_s14 }
  0x3c   : > { %p1406_p10 = pnand %p1404_p5, %p1360_p13  ;;  %p1412_p12 = scmp.lt.s32.totalorder %s1410_s27, %s1403_s19 }
  0x3e   : > { %p1407_p11 = pneg %p1406_p10  ;;  %p1413_p0 = por %p1412_p12, %p1411_p7 }
  0x40   : > { %p1414_p2 = pnand %p1413_p0, %p1407_p11 }
  0x42   : > { %1417 = shalt.err (!%p1414_p2)
}
  0x43   : > { %s1506_s25 = smov 64   ;;  %s1507_s20 = smov 4  }
  0x44   : > { %1239 = dma.hbm_to_vmem [thread:$0]  (!%p1621_p9), %s1668_s24, 4096, %s1670_s15, %s301_s23, %s1506_s25, %s1506_s25, %s1507_s20  }
  0x45   : > { %323 = sbr.rel (%p1659_p6) target bundleno = 929 (0x3a1), region = 52  ;;  %s325_s21 = sand.u32 (!%p1659_p6), 1, %s1486_s28  }
  0x46   : > { %s1094_s22 = sshll.u32 (!%p1659_p6), %s325_s21, 4  ;;  %s326_s19 = scalar_lea.sflag (!%p1659_p6), [#allocation4], %s325_s21 }
  0x47   : > { %s1701_s11 = scalar_lea.vmem (!%p1659_p6), [#allocation3], %s1094_s22  ;;  %p1869_p7 = scmp.ne.s32.totalorder (!%p1659_p6), %s1864_s16, 0 }
  0x4c   : > { %1469 = dma.done.wait (%p1869_p7), %s326_s19, 256  }
  0x4d   : > { %1471 = vsyncadd (%p1869_p7), %s326_s19, 4294967040  ;;  %s1095_s14 = sshll.u32 %s325_s21, 8  ;;  %s335_s26 = scalar_lea.sflag [#allocation7], %s325_s21 }
  0x4e   : > { %s1707_s18 = scalar_lea.vmem [#allocation6], %s1095_s14 }
  0x4f   : > { %1473 = dma.done.wait (%p1869_p7), %s335_s26, 4096  }
  0x50   : > { %1475 = vsyncadd (%p1869_p7), %s335_s26, 4294963200  ;;  %p1096_p9 = scmp.ne.s32.totalorder %s1494_s30, 0 }
  0x51   : > { %v1508_v0 = vmov (!%p1096_p9), 0.0  }
  0x52   : > { %377 = sbr.rel (%p1096_p9) target bundleno = 89 (0x59), region = 64  ;;  %378 = vst [vmem:[#allocation2] sm:$0xff] (!%p1096_p9), %v1508_v0 }
  0x59 PF: > { %v1296_v1 = vld [vmem:[%s1707_s18 + $0x40] sm:$0xff]   ;;  %v1300_v5 = vld [vmem:[%s1707_s18 + $0x48] sm:$0xff]   ;;  %v1304_v9 = vld [vmem:[%s1707_s18 + $0x50] sm:$0xff]   ;;  %p1133_p13 = scmp.ne.s32.totalorder %s1494_s30, 1 }
  0x5a   : > { %v1297_v2 = vld [vmem:[%s1707_s18 + $0xc0] sm:$0xff]   ;;  %1151 = vmatprep.subr.bf16.mxu0 %v1296_v1  ;;  %v1301_v6 = vld [vmem:[%s1707_s18 + $0xc8] sm:$0xff]   ;;  %v1305_v10 = vld [vmem:[%s1707_s18 + $0xd0] sm:$0xff]   ;;  %v1509_v54 = vmov (!%p1133_p13), 0  }
  0x5b   : > { %v1298_v3 = vld [vmem:[%s1707_s18] sm:$0xff]   ;;  %1173 = vmatprep.subr.bf16.mxu1 %v1297_v2  ;;  %v1302_v7 = vld [vmem:[%s1707_s18 + $0x8] sm:$0xff]   ;;  %v1306_v11 = vld [vmem:[%s1707_s18 + $0x10] sm:$0xff]   ;;  %1333 = vset.pattern.permute.xlu1 (!%p1133_p13), %v1509_v54 }
  0x5c   : > { %v1299_v4 = vld [vmem:[%s1707_s18 + $0x80] sm:$0xff]   ;;  %1152 = vmatpush3.bf16.msra.mxu0 %v1298_v3  ;;  %v1303_v8 = vld [vmem:[%s1707_s18 + $0x88] sm:$0xff]   ;;  %v1307_v12 = vld [vmem:[%s1707_s18 + $0x90] sm:$0xff]   ;;  %1332 = vset.pattern.permute.xlu0 (!%p1133_p13), %v1509_v54 }
  0x5d   : > { %1174 = vmatpush3.bf16.msra.mxu1 %v1299_v4  ;;  %1153 = vmatprep.subr.bf16.mxu0 %v1300_v5  ;;  %v1308_v13 = vld [vmem:[%s1707_s18 + $0x58] sm:$0xff]   ;;  %v1312_v17 = vld [vmem:[%s1707_s18 + $0x60] sm:$0xff]   ;;  %v1316_v21 = vld [vmem:[%s1707_s18 + $0x68] sm:$0xff]  }
  0x5e   : > { %1175 = vmatprep.subr.bf16.mxu1 %v1301_v6  ;;  %v1309_v14 = vld [vmem:[%s1707_s18 + $0xd8] sm:$0xff]   ;;  %v1313_v18 = vld [vmem:[%s1707_s18 + $0xe0] sm:$0xff]   ;;  %v1317_v22 = vld [vmem:[%s1707_s18 + $0xe8] sm:$0xff]  }
  0x5f   : > { %v1310_v15 = vld [vmem:[%s1707_s18 + $0x18] sm:$0xff]   ;;  %v1314_v19 = vld [vmem:[%s1707_s18 + $0x20] sm:$0xff]   ;;  %v1318_v23 = vld [vmem:[%s1707_s18 + $0x28] sm:$0xff]  }
  0x60   : > { %1154 = vmatpush3.bf16.msra.mxu0 %v1302_v7  ;;  %v1311_v16 = vld [vmem:[%s1707_s18 + $0x98] sm:$0xff]   ;;  %v1315_v20 = vld [vmem:[%s1707_s18 + $0xa0] sm:$0xff]   ;;  %v1319_v24 = vld [vmem:[%s1707_s18 + $0xa8] sm:$0xff]  }
  0x61   : > { %1176 = vmatpush3.bf16.msra.mxu1 %v1303_v8  ;;  %1155 = vmatprep.subr.bf16.mxu0 %v1304_v9  ;;  %v1320_v25 = vld [vmem:[%s1707_s18 + $0x70] sm:$0xff]   ;;  %v1324_v29 = vld [vmem:[%s1707_s18 + $0x78] sm:$0xff]   ;;  %v768_v55 = vld [vmem:[%s1859_s7 + $0x8] sm:$0xff] (!%p1133_p13) }
  0x62   : > { %1177 = vmatprep.subr.bf16.mxu1 %v1305_v10  ;;  %v1321_v26 = vld [vmem:[%s1707_s18 + $0xf0] sm:$0xff]   ;;  %v1325_v30 = vld [vmem:[%s1707_s18 + $0xf8] sm:$0xff]   ;;  %v740_v56 = vld [vmem:[%s1858_s6 + $0x8] sm:$0xff] (!%p1133_p13) }
  0x63   : > { %v1322_v27 = vld [vmem:[%s1707_s18 + $0x30] sm:$0xff]   ;;  %v1326_v31 = vld [vmem:[%s1707_s18 + $0x38] sm:$0xff]   ;;  %v1335_v58 = vld [vmem:[%s1856_s4 + $0x8] sm:$0xff] (!%p1133_p13)  }
  0x64   : > { %1156 = vmatpush3.bf16.msra.mxu0 %v1306_v11  ;;  %v1323_v28 = vld [vmem:[%s1707_s18 + $0xb0] sm:$0xff]   ;;  %v1327_v32 = vld [vmem:[%s1707_s18 + $0xb8] sm:$0xff]   ;;  %v741_v60 = vld [vmem:[%s1858_s6 + $0x10] sm:$0xff] (!%p1133_p13) }
  0x65   : > { %1178 = vmatpush3.bf16.msra.mxu1 %v1307_v12  ;;  %1157 = vmatprep.subr.bf16.mxu0 %v1308_v13  ;;  %v380_v33 = vld [vmem:[%s1701_s11] sm:$0xff]  ;;  %v381_v34 = vld [vmem:[%s1701_s11 + $0x8] sm:$0xff] }
  0x66   : > { %1179 = vmatprep.subr.bf16.mxu1 %v1309_v14  ;;  %v1097_v35 = vcombine.low %v380_v33, %v380_v33  ;;  %v1098_v36 = vcombine.high %v380_v33, %v380_v33  ;;  %v1099_v37 = vcombine.low %v381_v34, %v381_v34  ;;  %v1100_v38 = vcombine.high %v381_v34, %v381_v34  ;;  %v379_v47 = vld [vmem:[#allocation2] sm:$0xff]  ;;  %v742_v59 = vld [vmem:[%s1858_s6 + $0x18] sm:$0xff] (!%p1133_p13)  ;;  %v1336_v61 = vld [vmem:[%s1856_s4 + $0x10] sm:$0xff] (!%p1133_p13)  }
  0x67   : > { %v767_v52 = vld [vmem:[%s1859_s7] sm:$0xff] (!%p1133_p13)  ;;  %v770_v62 = vld [vmem:[%s1859_s7 + $0x18] sm:$0xff] (!%p1133_p13)  ;;  %v769_v63 = vld [vmem:[%s1859_s7 + $0x10] sm:$0xff] (!%p1133_p13) }
  0x68   : > { %1158 = vmatpush3.bf16.msra.mxu0 %v1310_v15  ;;  %684 = vmatprep.mubr.bf16.mxu0 %v1098_v36  ;;  %v739_v53 = vld [vmem:[%s1858_s6] sm:$0xff] (!%p1133_p13)  ;;  %v1337_v0 = vld [vmem:[%s1856_s4 + $0x18] sm:$0xff] (!%p1133_p13)   ;;  %v1339_v2 = vld [vmem:[%s1856_s4 + $0x28] sm:$0xff] (!%p1133_p13)  }
  0x69   : > { %1180 = vmatpush3.bf16.msra.mxu1 %v1311_v16  ;;  %1159 = vmatprep.subr.bf16.mxu0 %v1312_v17  ;;  %v1334_v57 = vld [vmem:[%s1856_s4] sm:$0xff] (!%p1133_p13)   ;;  %v1340_v3 = vld [vmem:[%s1856_s4 + $0x30] sm:$0xff] (!%p1133_p13)   ;;  %v1341_v4 = vld [vmem:[%s1856_s4 + $0x38] sm:$0xff] (!%p1133_p13)  }
  0x6a   : > { %1181 = vmatprep.subr.bf16.mxu1 %v1313_v18  ;;  %724 = vmatprep.mubr.bf16.mxu1 %v1100_v38  ;;  %v1338_v1 = vld [vmem:[%s1856_s4 + $0x20] sm:$0xff] (!%p1133_p13)  }
  0x6b   : > { %774 = vperm.xlu1 (!%p1133_p13), %1333, %v767_v52   ;;  %745 = vperm.xlu0 (!%p1133_p13), %1332, %v739_v53   ;;  %v1134_v5 = vld [vmem:[%s1854_s2] ss:$0 sm:$0xff] (!%p1133_p13) }
  0x6c   : > { %1160 = vmatpush3.bf16.msra.mxu0 %v1314_v19  ;;  %v1135_v14 = vld [vmem:[%s1855_s3] ss:$0 sm:$0xff] (!%p1133_p13) }
  0x6d   : > { %1182 = vmatpush3.bf16.msra.mxu1 %v1315_v20  ;;  %1161 = vmatprep.subr.bf16.mxu0 %v1316_v21  ;;  %v1136_v38 = vld [vmem:[%s1857_s5] ss:$0 sm:$0xff] (!%p1133_p13) }
  0x6e   : > { %1183 = vmatprep.subr.bf16.mxu1 %v1317_v22 }
  0x6f   : > { %779 = vperm.xlu1 (!%p1133_p13), %1333, %v768_v55   ;;  %750 = vperm.xlu0 (!%p1133_p13), %1332, %v740_v56  }
  0x70   : > { %1162 = vmatpush3.bf16.msra.mxu0 %v1318_v23 }
  0x71   : > { %1184 = vmatpush3.bf16.msra.mxu1 %v1319_v24  ;;  %1163 = vmatprep.subr.bf16.mxu0 %v1320_v25 }
  0x72   : > { %1185 = vmatprep.subr.bf16.mxu1 %v1321_v26 }
  0x73   : > { %760 = vperm.xlu1 (!%p1133_p13), %1333, %v742_v59   ;;  %755 = vperm.xlu0 (!%p1133_p13), %1332, %v741_v60  }
  0x74   : > { %1164 = vmatpush3.bf16.msra.mxu0 %v1322_v27 }
  0x75   : > { %1186 = vmatpush3.bf16.msra.mxu1 %v1323_v28  ;;  %1165 = vmatprep.subr.bf16.mxu0 %v1324_v29 }
  0x76   : > { %1187 = vmatprep.subr.bf16.mxu1 %v1325_v30 }
  0x77   : > { %789 = vperm.xlu1 (!%p1133_p13), %1333, %v770_v62   ;;  %784 = vperm.xlu0 (!%p1133_p13), %1332, %v769_v63  }
  0x78   : > { %1166 = vmatpush3.bf16.msra.mxu0 %v1326_v31 }
  0x79   : > { %1188 = vmatpush3.bf16.msra.mxu1 %v1327_v32  ;;  %1205 = vmatprep.subr.bf16.mxu0 (!%p1133_p13), %v1334_v57 }
  0x7b   : > { %685 = vmatmul.mubr.bf16.vlgmr.msra.gmra.mrb[0].mxu0 %v1097_v35 }
  0x7c   : > { %725 = vmatmul.mubr.bf16.vlgmr.msra.gmra.mrb[0].mxu1 %v1099_v37  ;;  %1206 = vmatpush3.bf16.msra.mxu0 (!%p1133_p13), %v1334_v57 }
  0x7d   : > { %1207 = vmatprep.subr.bf16.mxu0 (!%p1133_p13), %v1335_v58 }
  0x80   : > { %1208 = vmatpush3.bf16.msra.mxu0 (!%p1133_p13), %v1335_v58 }
  0x81   : > { %1209 = vmatprep.subr.bf16.mxu0 (!%p1133_p13), %v1336_v61 }
  0x84   : > { %1210 = vmatpush3.bf16.msra.mxu0 (!%p1133_p13), %v1336_v61 }
  0x85   : > { %1211 = vmatprep.subr.bf16.mxu0 (!%p1133_p13), %v1337_v0 }
  0x88   : > { %1212 = vmatpush3.bf16.msra.mxu0 (!%p1133_p13), %v1337_v0 }
  0x89   : > { %1213 = vmatprep.subr.bf16.mxu0 (!%p1133_p13), %v1338_v1 }
  0x8c   : > { %1214 = vmatpush3.bf16.msra.mxu0 (!%p1133_p13), %v1338_v1 }
  0x8d   : > { %1215 = vmatprep.subr.bf16.mxu0 (!%p1133_p13), %v1339_v2 }
  0x90   : > { %1216 = vmatpush3.bf16.msra.mxu0 (!%p1133_p13), %v1339_v2 }
  0x91   : > { %1217 = vmatprep.subr.bf16.mxu0 (!%p1133_p13), %v1340_v3 }
  0x94   : > { %1218 = vmatpush3.bf16.msra.mxu0 (!%p1133_p13), %v1340_v3 }
  0x95   : > { %1219 = vmatprep.subr.bf16.mxu0 (!%p1133_p13), %v1341_v4 }
  0x98   : > { %1220 = vmatpush3.bf16.msra.mxu0 (!%p1133_p13), %v1341_v4 }
  0xea   : > { %v775_v7 = vpop.permute.xlu1 (!%p1133_p13), %774  ;;  %v746_v8 = vpop.permute.xlu0 (!%p1133_p13), %745 }
  0xeb   : > { %v798_v9 = vmul.f32 (!%p1133_p13), %v1134_v5, %v775_v7 }
  0xee   : > { %v780_v12 = vpop.permute.xlu1 (!%p1133_p13), %779  ;;  %v751_v13 = vpop.permute.xlu0 (!%p1133_p13), %750 }
  0xef   : > { %v799_v15 = vmul.f32 (!%p1133_p13), %v1134_v5, %v780_v12 }
  0xf2   : > { %v761_v19 = vpop.permute.xlu1 (!%p1133_p13), %760  ;;  %v756_v20 = vpop.permute.xlu0 (!%p1133_p13), %755 }
  0xf6   : > { %v790_v25 = vpop.permute.xlu1 (!%p1133_p13), %789  ;;  %v785_v26 = vpop.permute.xlu0 (!%p1133_p13), %784 }
  0xf7   : > { %v801_v28 = vmul.f32 (!%p1133_p13), %v1134_v5, %v790_v25  ;;  %v800_v29 = vmul.f32 (!%p1133_p13), %v1134_v5, %v785_v26 }
 0x14e   : > { %v1167_v39 = vpop.f32.mrb[0].mxu0 }
 0x14f   : > { %v1189_v40 = vpop.f32.mrb[0].mxu1  ;;  %v1168_v41 = vpop.f32.mrb[1].mxu0 }
 0x150   : > { %v1190_v42 = vpop.f32.mrb[1].mxu1  ;;  %v1169_v43 = vadd.f32 %v1168_v41, %v1167_v39  ;;  %v1170_v45 = vpop.f32.mrb[2].mxu0 }
 0x151   : > { %v1191_v44 = vadd.f32 %v1190_v42, %v1189_v40  ;;  %v1192_v46 = vpop.f32.mrb[2].mxu1  ;;  %v1171_v48 = vpop.f32.mrb[3].mxu0  ;;  %737 = sbr.rel (%p1133_p13) target bundleno = 904 (0x388), region = 68 }
 0x152   : > { %v1193_v49 = vpop.f32.mrb[3].mxu1 }
 0x153   : > { %v727_v50 = vadd.f32 %v1191_v44, %v1169_v43 }
 0x155   : > { %v732_v51 = vadd.f32 %v727_v50, %v379_v47 }
 0x157   : > { %733 = vst [vmem:[#allocation2] sm:$0xff] %v732_v51 }
 0x15e   : > { %v738_v6 = vld [vmem:[#allocation2] sm:$0xff] }
 0x15f   : > { %v763_v10 = vmul.f32 %v746_v8, %v738_v6  ;;  %v764_v16 = vmul.f32 %v751_v13, %v738_v6  ;;  %v766_v24 = vmul.f32 %v761_v19, %v738_v6  ;;  %v765_v27 = vmul.f32 %v756_v20, %v738_v6 }
 0x161   : > { %v802_v11 = vadd.f32 %v798_v9, %v763_v10  ;;  %v803_v17 = vadd.f32 %v799_v15, %v764_v16  ;;  %v805_v31 = vadd.f32 %v801_v28, %v766_v24  ;;  %v804_v32 = vadd.f32 %v800_v29, %v765_v27 }
 0x163   : > { %v813_v18 = vadd.f32 %v1135_v14, %v802_v11  ;;  %v814_v21 = vadd.f32 %v1135_v14, %v803_v17  ;;  %v816_v33 = vadd.f32 %v1135_v14, %v805_v31  ;;  %v815_v34 = vadd.f32 %v1135_v14, %v804_v32 }
 0x165   : > { %v817_v22 = vmax.f32 %v813_v18, 0.0  ;;  %v818_v23 = vmax.f32 %v814_v21, 0.0  ;;  %v820_v35 = vmax.f32 %v816_v33, 0.0  ;;  %v819_v36 = vmax.f32 %v815_v34, 0.0 }
 0x167   : > { %v821_v30 = vpack.c.bf16 %v818_v23, %v817_v22  ;;  %v822_v37 = vpack.c.bf16 %v820_v35, %v819_v36 }
 0x169   : > { %1221 = vmatprep.mubr.bf16.mxu0 %v821_v30 }
 0x16a   : > { %1222 = vmatmul.mubr.bf16.vlgmr.msra.gmra.mrb[0].mxu0 %v822_v37 }
 0x23d   : > { %v1223_v39 = vpop.f32.mrb[0].mxu0 }
 0x23e   : > { %v928_v40 = vpop.f32.mrb[1].mxu0  ;;  %v937_v45 = vadd.f32 %v1223_v39, %v1136_v38 }
 0x23f   : > { %v929_v41 = vadd.f32 %v1136_v38, %v928_v40  ;;  %v1224_v42 = vpop.f32.mrb[2].mxu0 }
 0x240   : > { %v931_v43 = vpop.f32.mrb[3].mxu0  ;;  %v940_v46 = vadd.f32 %v1224_v42, %v1136_v38 }
 0x241   : > { %v932_v44 = vadd.f32 %v1136_v38, %v931_v43  ;;  %943 = vmax.xlane.f32.xlu0 %v929_v41 }
 0x243   : > { %945 = vmax.xlane.f32.xlu1 %v932_v44 }
 0x245   : > { %947 = vmax.xlane.f32.xlu0 %v937_v45 }
 0x249   : > { %949 = vmax.xlane.f32.xlu0 %v940_v46 }
 0x2ce   : > { %v944_v47 = vpop.xlane.xlu0 %943 }
 0x2cf   : > { %v951_v48 = vsub.f32 %v929_v41, %v944_v47 }
 0x2d0   : > { %v946_v49 = vpop.xlane.xlu1 %945 }
 0x2d1   : > { %v955_v50 = vmul.f32 1.442695, %v951_v48  ;;  %v952_v51 = vsub.f32 %v932_v44, %v946_v49 }
 0x2d2   : > { %v948_v52 = vpop.xlane.xlu0 %947 }
 0x2d3   : > { %1342 = vpow2.f32 %v955_v50  ;;  %v957_v53 = vmul.f32 1.442695, %v952_v51  ;;  %v953_v54 = vsub.f32 %v937_v45, %v948_v52 }
 0x2d5   : > { %1344 = vpow2.f32 %v957_v53  ;;  %v959_v55 = vmul.f32 1.442695, %v953_v54 }
 0x2d6   : > { %v950_v56 = vpop.xlane.xlu0 %949 }
 0x2d7   : > { %1346 = vpow2.f32 %v959_v55  ;;  %v954_v57 = vsub.f32 %v940_v46, %v950_v56 }
 0x2d9   : > { %v961_v58 = vmul.f32 1.442695, %v954_v57 }
 0x2db   : > { %1348 = vpow2.f32 %v961_v58 }
 0x2dd   : > { %v1343_v59 = vpop.eup %1342 }
 0x2de   : > { %963 = vadd.xlane.f32.xlu1 %v1343_v59 }
 0x2df   : > { %v1345_v60 = vpop.eup %1344 }
 0x2e0   : > { %965 = vadd.xlane.f32.xlu0 %v1345_v60 }
 0x2e1   : > { %v1347_v61 = vpop.eup %1346 }
 0x2e2   : > { %967 = vadd.xlane.f32.xlu1 %v1347_v61 }
 0x2e5   : > { %v1349_v62 = vpop.eup %1348 }
 0x2e6   : > { %969 = vadd.xlane.f32.xlu0 %v1349_v62 }
 0x36b   : > { %v964_v63 = vpop.xlane.xlu1 %963 }
 0x36c   : > { %1350 = vlog2.f32 %v964_v63 }
 0x36d   : > { %v966_v0 = vpop.xlane.xlu0 %965 }
 0x36e   : > { %1352 = vlog2.f32 %v966_v0 }
 0x36f   : > { %v968_v1 = vpop.xlane.xlu1 %967 }
 0x370   : > { %1354 = vlog2.f32 %v968_v1 }
 0x373   : > { %v970_v2 = vpop.xlane.xlu0 %969 }
 0x374   : > { %1356 = vlog2.f32 %v970_v2 }
 0x376   : > { %v1351_v3 = vpop.eup %1350 }
 0x377   : > { %v972_v4 = vmul.f32 0.6931472, %v1351_v3 }
 0x378   : > { %v1353_v5 = vpop.eup %1352 }
 0x379   : > { %v974_v6 = vmul.f32 0.6931472, %v1353_v5  ;;  %v979_v8 = vsub.f32 %v951_v48, %v972_v4 }
 0x37a   : > { %v1355_v7 = vpop.eup %1354 }
 0x37b   : > { %v980_v9 = vsub.f32 %v952_v51, %v974_v6  ;;  %v976_v10 = vmul.f32 0.6931472, %v1355_v7 }
 0x37d   : > { %v983_v11 = vadd.f32 %v980_v9, %v979_v8  ;;  %v981_v12 = vsub.f32 %v953_v54, %v976_v10 }
 0x37e   : > { %v1357_v13 = vpop.eup %1356 }
 0x37f   : > { %v978_v14 = vmul.f32 0.6931472, %v1357_v13  ;;  %v984_v15 = vadd.f32 %v983_v11, %v981_v12 }
 0x381   : > { %v982_v16 = vsub.f32 %v954_v57, %v978_v14 }
 0x383   : > { %v985_v17 = vadd.f32 %v984_v15, %v982_v16 }
 0x385   : > { %v986_v18 = vmul.f32 0.25, %v985_v17 }
 0x387   : > { %987 = vst [vmem:[#allocation8] sm:$0xff] %v986_v18 }
 0x388 PF: > { %s1870_s25 = sadd.s32 4294967295, %s1502_s10   ;;  %s1510_s20 = smov [#allocation8]  }
 0x389   : > { %p1808_p6 = scmp.eq.s32.totalorder %s1870_s25, 1  ;;  %s997_s21 = sshll.u32 %s1510_s20, 4  ;;  %s998_s21 = int_to_ptr.vmem [resolvable:$true] %s997_s21 }
 0x38a   : > { %s1418_s22 = scalar_lea.vmem %s998_s21, 128  ;;  %p1425_p1 = scmp.lt.s32.totalorder %s998_s21, %s998_s21 }
 0x38b   : > { %p1419_p8 = scmp.ne.s32.totalorder %s998_s21, %s1418_s22  ;;  %p1426_p5 = scmp.lt.s32.totalorder %s1418_s22, %s1418_s22 }
 0x38d   : > { %p1420_p3 = pnand %p1419_p8, %p1808_p6  ;;  %p1427_p10 = por %p1426_p5, %p1425_p1 }
 0x38f   : > { %p1421_p4 = pneg %p1420_p3 }
 0x391   : > { %p1428_p11 = pnand %p1427_p10, %p1421_p4 }
 0x393   : > { %1431 = shalt.err (!%p1428_p11)
}
 0x394   : > { %s1432_s14 = scalar_lea.hbm %s1860_s8, 128 }
 0x395   : > { %p1433_p12 = scmp.ne.s32.totalorder %s1860_s8, %s1432_s14  ;;  %p1438_p7 = scmp.lt.u32.totalorder %s1432_s14, %s1860_s8 }
 0x397   : > { %p1434_p0 = pnand %p1433_p12, %p1808_p6 }
 0x399   : > { %p1435_p2 = pneg %p1434_p0 }
 0x39b   : > { %p1440_p9 = pnand %p1438_p7, %p1435_p2 }
 0x39d   : > { %1443 = shalt.err (!%p1440_p9)
}
 0x39e   : > { %1230 = dma.vmem_to_hbm [thread:$0]  (%p1808_p6), %s998_s21, 128, %s1860_s8, [#allocation5]  }
 0x39f   : > { %1477 = dma.done.wait (%p1808_p6), [#allocation5], 128  }
 0x3a0   : > { %1479 = vsyncadd (%p1808_p6), [#allocation5], 4294967168 }
 0x3a1 PF: > { %s25_s10 = sadd.s32 1, %s1502_s10   ;;  %s1872_s27 = smov %s1486_s28 }
 0x3a2   : > { %p22_p13 = scmp.ge.s32.totalorder %s25_s10, 4   ;;  %s1873_s28 = smov %s1490_s29 }
 0x3a3   : > { %s1874_s29 = smov %s1607_s17  ;;  %s1875_s30 = smov %s1498_s9 }
 0x3a4   : > { %s1876_s9 = smov %s1878_s12  ;;  %24 = sbr.rel (!%p22_p13) target bundleno = 7 (0x7), region = 111 }
 0x3ab   :  { %1010 = vsyncpa [#allocation4], 1 }
 0x3ac   :  { %1012 = vsyncpa [#allocation4 + $0x1], 1 }
 0x3ad   :  { %1013 = vsyncpa [#allocation7], 1 }
 0x3ae   :  { %1015 = vsyncpa [#allocation7 + $0x1], 1 }
 0x3af   :  { %1016 = vsyncpa [#allocation5], 1 }
 0x3b0   :  { %1018 = vsyncpa [#allocation5 + $0x1], 1 }

</bundles_post_ra>
